<compile_context>
chip_gen: v7x
topology: tpu7x:2x2x1
jax: 0.10.0
libtpu: 0.0.40
codegen_flags: <defaults>
</compile_context>

<pallas_src>
import math
import functools

import jax
import jax.numpy as jnp
from jax import lax
from jax.experimental import pallas as pl
from jax.experimental.pallas import tpu as pltpu


def _lstm_chunk_kernel(xw_ref, u_ref, h0_ref, c0_ref,
                       hseq_ref, h_ref, c_ref):
    """One grid step = (batch block, time chunk).

    xw_ref   : (chunk_t, block_bs, 4*HS)  precomputed x @ W + bias (time-major)
    u_ref    : (HS, 4*HS)                 recurrent weights (constant block)
    h0_ref   : (block_bs, HS)             initial hidden state for this batch block
    c0_ref   : (block_bs, HS)             initial cell state
    hseq_ref : (chunk_t, block_bs, HS)    hidden states for this chunk (output)
    h_ref    : (block_bs, HS)             running hidden state (VMEM-resident
                                          across the inner time-chunk axis)
    c_ref    : (block_bs, HS)             running cell state
    """
    tc = pl.program_id(1)            # time-chunk index (inner, sequential axis)

    # Recurrence starts from the provided initial state at the first chunk.
    @pl.when(tc == 0)
    def _():
        h_ref[...] = h0_ref[...]
        c_ref[...] = c0_ref[...]

    HS = u_ref.shape[0]
    chunk_t = xw_ref.shape[0]

    # Load U once per chunk; it stays resident (constant block index).
    # NOTE(v6e/v7x): casting `u` and `h` to bf16 here (keeping
    # preferred_element_type=f32 and all elementwise math in f32) doubles MXU
    # throughput; left in f32 so the 1e-5 reference check stays tight.
    u = u_ref[...]

    def step(t, carry):
        h, c = carry
        # x@W + bias was hoisted out of the loop; only h @ U remains serial.
        gates = xw_ref[t] + jnp.dot(h, u, preferred_element_type=jnp.float32)
        i_t = jax.nn.sigmoid(gates[:, 0 * HS:1 * HS])
        f_t = jax.nn.sigmoid(gates[:, 1 * HS:2 * HS])
        g_t = jnp.tanh(gates[:, 2 * HS:3 * HS])
        o_t = jax.nn.sigmoid(gates[:, 3 * HS:4 * HS])
        c_new = f_t * c + i_t * g_t
        h_new = o_t * jnp.tanh(c_new)
        hseq_ref[t] = h_new.astype(hseq_ref.dtype)   # VMEM write; DMA'd per chunk
        return h_new, c_new

    h_fin, c_fin = lax.fori_loop(
        0, chunk_t, step, (h_ref[...], c_ref[...]),
        unroll=(chunk_t <= 16),
    )
    h_ref[...] = h_fin
    c_ref[...] = c_fin


@functools.partial(jax.jit, static_argnames=("time_chunk", "batch_block"))
def my_lstm_forward(x, W, U, bias, init_states=None, *,
                    time_chunk=None, batch_block=None):
    """x: (batch, seq, input_size). Returns (hidden_seq, (h_t, c_t)).

    Matches MyLSTM.forward: hidden_seq is (batch, seq, hidden_size).
    """
    bs, seq_sz, _ = x.shape
    HS = U.shape[0]

    # --- tiling choices -----------------------------------------------------
    if time_chunk is None:
        time_chunk = seq_sz if seq_sz <= 64 else math.gcd(seq_sz, 64)
    if batch_block is None:
        batch_block = bs            # split (multiple of 8) to shard across TCs
    assert seq_sz % time_chunk == 0
    assert bs % batch_block == 0
    n_tc = seq_sz // time_chunk
    n_bb = bs // batch_block

    # --- hoisted input projection (parallel over all timesteps) -------------
    # 'bti,ig->tbg' fuses the time-major transpose into the matmul output,
    # and the bias is folded in here (removed from the serial loop).
    xw = jnp.einsum("bti,ig->tbg",
                    x.astype(jnp.float32), W.astype(jnp.float32),
                    preferred_element_type=jnp.float32) + bias[None, None, :]

    # --- initial state -------------------------------------------------------
    if init_states is None:
        h0 = jnp.zeros((bs, HS), jnp.float32)
        c0 = jnp.zeros((bs, HS), jnp.float32)
    else:
        h0, c0 = init_states
        h0 = h0.astype(jnp.float32)
        c0 = c0.astype(jnp.float32)

    out_shapes = (
        jax.ShapeDtypeStruct((seq_sz, bs, HS), jnp.float32),  # hidden_seq (time-major)
        jax.ShapeDtypeStruct((bs, HS), jnp.float32),          # h_t
        jax.ShapeDtypeStruct((bs, HS), jnp.float32),          # c_t
    )

    grid_spec = pltpu.PrefetchScalarGridSpec(
        num_scalar_prefetch=0,
        grid=(n_bb, n_tc),      # batch blocks (parallel) x time chunks (sequential)
        in_specs=[
            pl.BlockSpec((time_chunk, batch_block, 4 * HS),
                         lambda bb, tc: (tc, bb, 0)),          # xW chunk
            pl.BlockSpec((HS, 4 * HS), lambda bb, tc: (0, 0)),  # U (whole, resident)
            pl.BlockSpec((batch_block, HS), lambda bb, tc: (bb, 0)),  # h0
            pl.BlockSpec((batch_block, HS), lambda bb, tc: (bb, 0)),  # c0
        ],
        out_specs=[
            pl.BlockSpec((time_chunk, batch_block, HS),
                         lambda bb, tc: (tc, bb, 0)),          # hidden_seq chunk
            pl.BlockSpec((batch_block, HS), lambda bb, tc: (bb, 0)),  # h_t (resident)
            pl.BlockSpec((batch_block, HS), lambda bb, tc: (bb, 0)),  # c_t (resident)
        ],
    )

    hseq_tm, h_t, c_t = pl.pallas_call(
        _lstm_chunk_kernel,
        out_shape=out_shapes,
        grid_spec=grid_spec,
        compiler_params=pltpu.CompilerParams(
            # batch blocks are independent; time chunks carry the recurrence.
            dimension_semantics=("parallel", "arbitrary"),
        ),
    )(xw, U, h0, c0)

    hidden_seq = jnp.transpose(hseq_tm, (1, 0, 2))  # (bs, seq, HS)
    return hidden_seq, (h_t, c_t)


def _reference_lstm(x, W, U, bias, init_states=None):
    """Pure-JAX reference matching the PyTorch forward exactly."""
    bs, seq_sz, _ = x.shape
    HS = U.shape[0]
    if init_states is None:
        h = jnp.zeros((bs, HS), jnp.float32)
        c = jnp.zeros((bs, HS), jnp.float32)
    else:
        h, c = init_states
    hs = []
    for t in range(seq_sz):
        gates = x[:, t, :] @ W + h @ U + bias
        i = jax.nn.sigmoid(gates[:, :HS])
        f = jax.nn.sigmoid(gates[:, HS:2 * HS])
        g = jnp.tanh(gates[:, 2 * HS:3 * HS])
        o = jax.nn.sigmoid(gates[:, 3 * HS:])
        c = f * c + i * g
        h = o * jnp.tanh(c)
        hs.append(h)
    return jnp.stack(hs, axis=1), (h, c)


if __name__ == "__main__":
    # Small shapes consistent with the module: x -> (batch, sequence, feature)
    batch, seq, input_size, hidden_size = 8, 8, 16, 32

    key = jax.random.PRNGKey(0)
    kx, kw, ku, kb, kh, kc = jax.random.split(key, 6)

    # Deterministic init matching nn.init uniform_(-stdv, stdv)
    stdv = 1.0 / math.sqrt(hidden_size)
    W = jax.random.uniform(kw, (input_size, hidden_size * 4), jnp.float32, -stdv, stdv)
    U = jax.random.uniform(ku, (hidden_size, hidden_size * 4), jnp.float32, -stdv, stdv)
    bias = jax.random.uniform(kb, (hidden_size * 4,), jnp.float32, -stdv, stdv)

    x = jax.random.normal(kx, (batch, seq, input_size), jnp.float32)

    # --- default path (init_states=None -> zeros) ---------------------------
    hidden_seq, (h_t, c_t) = my_lstm_forward(x, W, U, bias)
    jax.block_until_ready((hidden_seq, h_t, c_t))

    ref_seq, (ref_h, ref_c) = _reference_lstm(x, W, U, bias)
    assert jnp.allclose(hidden_seq, ref_seq, atol=1e-5, rtol=1e-5)
    assert jnp.allclose(h_t, ref_h, atol=1e-5, rtol=1e-5)
    assert jnp.allclose(c_t, ref_c, atol=1e-5, rtol=1e-5)

    # --- explicit init_states path ------------------------------------------
    h0 = 0.1 * jax.random.normal(kh, (batch, hidden_size), jnp.float32)
    c0 = 0.1 * jax.random.normal(kc, (batch, hidden_size), jnp.float32)
    hidden_seq2, (h_t2, c_t2) = my_lstm_forward(x, W, U, bias, (h0, c0))
    jax.block_until_ready((hidden_seq2, h_t2, c_t2))

    ref_seq2, (ref_h2, ref_c2) = _reference_lstm(x, W, U, bias, (h0, c0))
    assert jnp.allclose(hidden_seq2, ref_seq2, atol=1e-5, rtol=1e-5)
    assert jnp.allclose(h_t2, ref_h2, atol=1e-5, rtol=1e-5)
    assert jnp.allclose(c_t2, ref_c2, atol=1e-5, rtol=1e-5)

    print("KERNEL_OK")
</pallas_src>

<mosaic_0001>
module attributes {stable_mosaic.version = 11 : i64} {
  func.func @_lstm_chunk_kernel(%arg0: i32, %arg1: i32, %arg2: memref<8x8x128xf32, #tpu.memory_space<vmem>>, %arg3: memref<32x128xf32, #tpu.memory_space<vmem>>, %arg4: memref<8x32xf32, #tpu.memory_space<vmem>>, %arg5: memref<8x32xf32, #tpu.memory_space<vmem>>, %arg6: memref<8x8x32xf32, #tpu.memory_space<vmem>>, %arg7: memref<8x32xf32, #tpu.memory_space<vmem>>, %arg8: memref<8x32xf32, #tpu.memory_space<vmem>>) attributes {dimension_semantics = [#tpu.dimension_semantics<parallel>, #tpu.dimension_semantics<arbitrary>], iteration_bounds = array<i64: 1, 1>, scalar_prefetch = 0 : i64, scratch_operands = 0 : i64, tpu.core_type = #tpu.core_type<tc>, window_params = [{transform_indices = @transform_0, window_bounds = array<i64: 8, 8, 128>}, {pipeline_mode = #tpu.pipeline_mode<synchronous>, transform_indices = @transform_1, window_bounds = array<i64: 32, 128>}, {transform_indices = @transform_2, window_bounds = array<i64: 8, 32>}, {transform_indices = @transform_3, window_bounds = array<i64: 8, 32>}, {transform_indices = @transform_4, window_bounds = array<i64: 8, 8, 32>}, {transform_indices = @transform_5, window_bounds = array<i64: 8, 32>}, {transform_indices = @transform_6, window_bounds = array<i64: 8, 32>}]} {
    %c0_i32 = arith.constant 0 : i32
    %0 = arith.cmpi eq, %arg1, %c0_i32 : i32
    %1 = arith.extui %0 : i1 to i32
    %c0_i32_0 = arith.constant 0 : i32
    %2 = arith.cmpi ne, %1, %c0_i32_0 : i32
    scf.if %2 {
      %c0_74 = arith.constant 0 : index
      %c0_75 = arith.constant 0 : index
      %280 = vector.load %arg4[%c0_74, %c0_75] : memref<8x32xf32, #tpu.memory_space<vmem>>, vector<8x32xf32>
      %c0_76 = arith.constant 0 : index
      %c0_77 = arith.constant 0 : index
      %281 = vector.load %arg7[%c0_76, %c0_77] : memref<8x32xf32, #tpu.memory_space<vmem>>, vector<8x32xf32>
      tpu.vector_store %arg7[%c0_76, %c0_77], %280 {strides = array<i32>} : memref<8x32xf32, #tpu.memory_space<vmem>>, vector<8x32xf32>,
      %c0_78 = arith.constant 0 : index
      %c0_79 = arith.constant 0 : index
      %282 = vector.load %arg5[%c0_78, %c0_79] : memref<8x32xf32, #tpu.memory_space<vmem>>, vector<8x32xf32>
      %c0_80 = arith.constant 0 : index
      %c0_81 = arith.constant 0 : index
      %283 = vector.load %arg8[%c0_80, %c0_81] : memref<8x32xf32, #tpu.memory_space<vmem>>, vector<8x32xf32>
      tpu.vector_store %arg8[%c0_80, %c0_81], %282 {strides = array<i32>} : memref<8x32xf32, #tpu.memory_space<vmem>>, vector<8x32xf32>,
    } else {
    }
    %c0 = arith.constant 0 : index
    %c0_1 = arith.constant 0 : index
    %3 = vector.load %arg3[%c0, %c0_1] : memref<32x128xf32, #tpu.memory_space<vmem>>, vector<32x128xf32>
    %c0_2 = arith.constant 0 : index
    %c0_3 = arith.constant 0 : index
    %4 = vector.load %arg7[%c0_2, %c0_3] : memref<8x32xf32, #tpu.memory_space<vmem>>, vector<8x32xf32>
    %c0_4 = arith.constant 0 : index
    %c0_5 = arith.constant 0 : index
    %5 = vector.load %arg8[%c0_4, %c0_5] : memref<8x32xf32, #tpu.memory_space<vmem>>, vector<8x32xf32>
    %c0_i32_6 = arith.constant 0 : i32
    %6 = arith.index_cast %c0_i32_6 : i32 to index
    %c0_7 = arith.constant 0 : index
    %c0_8 = arith.constant 0 : index
    %7 = vector.load %arg2[%6, %c0_7, %c0_8] : memref<8x8x128xf32, #tpu.memory_space<vmem>>, vector<1x8x128xf32>
    %8 = vector.shape_cast %7 : vector<1x8x128xf32> to vector<8x128xf32>
    %cst = arith.constant dense<0.000000e+00> : vector<8x128xf32>
    %9 = tpu.matmul %4, %3, %cst {dimension_numbers = #tpu.dot_dimension_numbers<[1], [0], [0], [1], [0, 0, 1, 1], [], []>} : vector<8x32xf32>, vector<32x128xf32>, vector<8x128xf32> -> vector<8x128xf32>
    %10 = arith.addf %8, %9 : vector<8x128xf32>
    %11 = vector.extract_strided_slice %10 {offsets = [0, 0], sizes = [8, 32], strides = [1, 1]} : vector<8x128xf32> to vector<8x32xf32>
    %12 = arith.negf %11 : vector<8x32xf32>
    %13 = math.exp %12 : vector<8x32xf32>
    %cst_9 = arith.constant 1.000000e+00 : f32
    %14 = vector.broadcast %cst_9 : f32 to vector<8x32xf32>
    %15 = arith.addf %14, %13 : vector<8x32xf32>
    %16 = arith.divf %14, %15 : vector<8x32xf32>
    %17 = vector.extract_strided_slice %10 {offsets = [0, 32], sizes = [8, 32], strides = [1, 1]} : vector<8x128xf32> to vector<8x32xf32>
    %18 = arith.negf %17 : vector<8x32xf32>
    %19 = math.exp %18 : vector<8x32xf32>
    %cst_10 = arith.constant 1.000000e+00 : f32
    %20 = vector.broadcast %cst_10 : f32 to vector<8x32xf32>
    %21 = arith.addf %20, %19 : vector<8x32xf32>
    %22 = arith.divf %20, %21 : vector<8x32xf32>
    %23 = vector.extract_strided_slice %10 {offsets = [0, 64], sizes = [8, 32], strides = [1, 1]} : vector<8x128xf32> to vector<8x32xf32>
    %24 = math.tanh %23 : vector<8x32xf32>
    %25 = vector.extract_strided_slice %10 {offsets = [0, 96], sizes = [8, 32], strides = [1, 1]} : vector<8x128xf32> to vector<8x32xf32>
    %26 = arith.negf %25 : vector<8x32xf32>
    %27 = math.exp %26 : vector<8x32xf32>
    %cst_11 = arith.constant 1.000000e+00 : f32
    %28 = vector.broadcast %cst_11 : f32 to vector<8x32xf32>
    %29 = arith.addf %28, %27 : vector<8x32xf32>
    %30 = arith.divf %28, %29 : vector<8x32xf32>
    %31 = arith.mulf %22, %5 : vector<8x32xf32>
    %32 = arith.mulf %16, %24 : vector<8x32xf32>
    %33 = arith.addf %31, %32 : vector<8x32xf32>
    %34 = math.tanh %33 : vector<8x32xf32>
    %35 = arith.mulf %30, %34 : vector<8x32xf32>
    %36 = arith.index_cast %c0_i32_6 : i32 to index
    %c0_12 = arith.constant 0 : index
    %c0_13 = arith.constant 0 : index
    %37 = vector.load %arg6[%36, %c0_12, %c0_13] : memref<8x8x32xf32, #tpu.memory_space<vmem>>, vector<1x8x32xf32>
    %38 = vector.shape_cast %37 : vector<1x8x32xf32> to vector<8x32xf32>
    %39 = vector.shape_cast %35 : vector<8x32xf32> to vector<1x8x32xf32>
    tpu.vector_store %arg6[%36, %c0_12, %c0_13], %39 {strides = array<i32>} : memref<8x8x32xf32, #tpu.memory_space<vmem>>, vector<1x8x32xf32>,
    %c1_i32 = arith.constant 1 : i32
    %40 = arith.index_cast %c1_i32 : i32 to index
    %c0_14 = arith.constant 0 : index
    %c0_15 = arith.constant 0 : index
    %41 = vector.load %arg2[%40, %c0_14, %c0_15] : memref<8x8x128xf32, #tpu.memory_space<vmem>>, vector<1x8x128xf32>
    %42 = vector.shape_cast %41 : vector<1x8x128xf32> to vector<8x128xf32>
    %cst_16 = arith.constant dense<0.000000e+00> : vector<8x128xf32>
    %43 = tpu.matmul %35, %3, %cst_16 {dimension_numbers = #tpu.dot_dimension_numbers<[1], [0], [0], [1], [0, 0, 1, 1], [], []>} : vector<8x32xf32>, vector<32x128xf32>, vector<8x128xf32> -> vector<8x128xf32>
    %44 = arith.addf %42, %43 : vector<8x128xf32>
    %45 = vector.extract_strided_slice %44 {offsets = [0, 0], sizes = [8, 32], strides = [1, 1]} : vector<8x128xf32> to vector<8x32xf32>
    %46 = arith.negf %45 : vector<8x32xf32>
    %47 = math.exp %46 : vector<8x32xf32>
    %cst_17 = arith.constant 1.000000e+00 : f32
    %48 = vector.broadcast %cst_17 : f32 to vector<8x32xf32>
    %49 = arith.addf %48, %47 : vector<8x32xf32>
    %50 = arith.divf %48, %49 : vector<8x32xf32>
    %51 = vector.extract_strided_slice %44 {offsets = [0, 32], sizes = [8, 32], strides = [1, 1]} : vector<8x128xf32> to vector<8x32xf32>
    %52 = arith.negf %51 : vector<8x32xf32>
    %53 = math.exp %52 : vector<8x32xf32>
    %cst_18 = arith.constant 1.000000e+00 : f32
    %54 = vector.broadcast %cst_18 : f32 to vector<8x32xf32>
    %55 = arith.addf %54, %53 : vector<8x32xf32>
    %56 = arith.divf %54, %55 : vector<8x32xf32>
    %57 = vector.extract_strided_slice %44 {offsets = [0, 64], sizes = [8, 32], strides = [1, 1]} : vector<8x128xf32> to vector<8x32xf32>
    %58 = math.tanh %57 : vector<8x32xf32>
    %59 = vector.extract_strided_slice %44 {offsets = [0, 96], sizes = [8, 32], strides = [1, 1]} : vector<8x128xf32> to vector<8x32xf32>
    %60 = arith.negf %59 : vector<8x32xf32>
    %61 = math.exp %60 : vector<8x32xf32>
    %cst_19 = arith.constant 1.000000e+00 : f32
    %62 = vector.broadcast %cst_19 : f32 to vector<8x32xf32>
    %63 = arith.addf %62, %61 : vector<8x32xf32>
    %64 = arith.divf %62, %63 : vector<8x32xf32>
    %65 = arith.mulf %56, %33 : vector<8x32xf32>
    %66 = arith.mulf %50, %58 : vector<8x32xf32>
    %67 = arith.addf %65, %66 : vector<8x32xf32>
    %68 = math.tanh %67 : vector<8x32xf32>
    %69 = arith.mulf %64, %68 : vector<8x32xf32>
    %70 = arith.index_cast %c1_i32 : i32 to index
    %c0_20 = arith.constant 0 : index
    %c0_21 = arith.constant 0 : index
    %71 = vector.load %arg6[%70, %c0_20, %c0_21] : memref<8x8x32xf32, #tpu.memory_space<vmem>>, vector<1x8x32xf32>
    %72 = vector.shape_cast %71 : vector<1x8x32xf32> to vector<8x32xf32>
    %73 = vector.shape_cast %69 : vector<8x32xf32> to vector<1x8x32xf32>
    tpu.vector_store %arg6[%70, %c0_20, %c0_21], %73 {strides = array<i32>} : memref<8x8x32xf32, #tpu.memory_space<vmem>>, vector<1x8x32xf32>,
    %c2_i32 = arith.constant 2 : i32
    %74 = arith.index_cast %c2_i32 : i32 to index
    %c0_22 = arith.constant 0 : index
    %c0_23 = arith.constant 0 : index
    %75 = vector.load %arg2[%74, %c0_22, %c0_23] : memref<8x8x128xf32, #tpu.memory_space<vmem>>, vector<1x8x128xf32>
    %76 = vector.shape_cast %75 : vector<1x8x128xf32> to vector<8x128xf32>
    %cst_24 = arith.constant dense<0.000000e+00> : vector<8x128xf32>
    %77 = tpu.matmul %69, %3, %cst_24 {dimension_numbers = #tpu.dot_dimension_numbers<[1], [0], [0], [1], [0, 0, 1, 1], [], []>} : vector<8x32xf32>, vector<32x128xf32>, vector<8x128xf32> -> vector<8x128xf32>
    %78 = arith.addf %76, %77 : vector<8x128xf32>
    %79 = vector.extract_strided_slice %78 {offsets = [0, 0], sizes = [8, 32], strides = [1, 1]} : vector<8x128xf32> to vector<8x32xf32>
    %80 = arith.negf %79 : vector<8x32xf32>
    %81 = math.exp %80 : vector<8x32xf32>
    %cst_25 = arith.constant 1.000000e+00 : f32
    %82 = vector.broadcast %cst_25 : f32 to vector<8x32xf32>
    %83 = arith.addf %82, %81 : vector<8x32xf32>
    %84 = arith.divf %82, %83 : vector<8x32xf32>
    %85 = vector.extract_strided_slice %78 {offsets = [0, 32], sizes = [8, 32], strides = [1, 1]} : vector<8x128xf32> to vector<8x32xf32>
    %86 = arith.negf %85 : vector<8x32xf32>
    %87 = math.exp %86 : vector<8x32xf32>
    %cst_26 = arith.constant 1.000000e+00 : f32
    %88 = vector.broadcast %cst_26 : f32 to vector<8x32xf32>
    %89 = arith.addf %88, %87 : vector<8x32xf32>
    %90 = arith.divf %88, %89 : vector<8x32xf32>
    %91 = vector.extract_strided_slice %78 {offsets = [0, 64], sizes = [8, 32], strides = [1, 1]} : vector<8x128xf32> to vector<8x32xf32>
    %92 = math.tanh %91 : vector<8x32xf32>
    %93 = vector.extract_strided_slice %78 {offsets = [0, 96], sizes = [8, 32], strides = [1, 1]} : vector<8x128xf32> to vector<8x32xf32>
    %94 = arith.negf %93 : vector<8x32xf32>
    %95 = math.exp %94 : vector<8x32xf32>
    %cst_27 = arith.constant 1.000000e+00 : f32
    %96 = vector.broadcast %cst_27 : f32 to vector<8x32xf32>
    %97 = arith.addf %96, %95 : vector<8x32xf32>
    %98 = arith.divf %96, %97 : vector<8x32xf32>
    %99 = arith.mulf %90, %67 : vector<8x32xf32>
    %100 = arith.mulf %84, %92 : vector<8x32xf32>
    %101 = arith.addf %99, %100 : vector<8x32xf32>
    %102 = math.tanh %101 : vector<8x32xf32>
    %103 = arith.mulf %98, %102 : vector<8x32xf32>
    %104 = arith.index_cast %c2_i32 : i32 to index
    %c0_28 = arith.constant 0 : index
    %c0_29 = arith.constant 0 : index
    %105 = vector.load %arg6[%104, %c0_28, %c0_29] : memref<8x8x32xf32, #tpu.memory_space<vmem>>, vector<1x8x32xf32>
    %106 = vector.shape_cast %105 : vector<1x8x32xf32> to vector<8x32xf32>
    %107 = vector.shape_cast %103 : vector<8x32xf32> to vector<1x8x32xf32>
    tpu.vector_store %arg6[%104, %c0_28, %c0_29], %107 {strides = array<i32>} : memref<8x8x32xf32, #tpu.memory_space<vmem>>, vector<1x8x32xf32>,
    %c3_i32 = arith.constant 3 : i32
    %108 = arith.index_cast %c3_i32 : i32 to index
    %c0_30 = arith.constant 0 : index
    %c0_31 = arith.constant 0 : index
    %109 = vector.load %arg2[%108, %c0_30, %c0_31] : memref<8x8x128xf32, #tpu.memory_space<vmem>>, vector<1x8x128xf32>
    %110 = vector.shape_cast %109 : vector<1x8x128xf32> to vector<8x128xf32>
    %cst_32 = arith.constant dense<0.000000e+00> : vector<8x128xf32>
    %111 = tpu.matmul %103, %3, %cst_32 {dimension_numbers = #tpu.dot_dimension_numbers<[1], [0], [0], [1], [0, 0, 1, 1], [], []>} : vector<8x32xf32>, vector<32x128xf32>, vector<8x128xf32> -> vector<8x128xf32>
    %112 = arith.addf %110, %111 : vector<8x128xf32>
    %113 = vector.extract_strided_slice %112 {offsets = [0, 0], sizes = [8, 32], strides = [1, 1]} : vector<8x128xf32> to vector<8x32xf32>
    %114 = arith.negf %113 : vector<8x32xf32>
    %115 = math.exp %114 : vector<8x32xf32>
    %cst_33 = arith.constant 1.000000e+00 : f32
    %116 = vector.broadcast %cst_33 : f32 to vector<8x32xf32>
    %117 = arith.addf %116, %115 : vector<8x32xf32>
    %118 = arith.divf %116, %117 : vector<8x32xf32>
    %119 = vector.extract_strided_slice %112 {offsets = [0, 32], sizes = [8, 32], strides = [1, 1]} : vector<8x128xf32> to vector<8x32xf32>
    %120 = arith.negf %119 : vector<8x32xf32>
    %121 = math.exp %120 : vector<8x32xf32>
    %cst_34 = arith.constant 1.000000e+00 : f32
    %122 = vector.broadcast %cst_34 : f32 to vector<8x32xf32>
    %123 = arith.addf %122, %121 : vector<8x32xf32>
    %124 = arith.divf %122, %123 : vector<8x32xf32>
    %125 = vector.extract_strided_slice %112 {offsets = [0, 64], sizes = [8, 32], strides = [1, 1]} : vector<8x128xf32> to vector<8x32xf32>
    %126 = math.tanh %125 : vector<8x32xf32>
    %127 = vector.extract_strided_slice %112 {offsets = [0, 96], sizes = [8, 32], strides = [1, 1]} : vector<8x128xf32> to vector<8x32xf32>
    %128 = arith.negf %127 : vector<8x32xf32>
    %129 = math.exp %128 : vector<8x32xf32>
    %cst_35 = arith.constant 1.000000e+00 : f32
    %130 = vector.broadcast %cst_35 : f32 to vector<8x32xf32>
    %131 = arith.addf %130, %129 : vector<8x32xf32>
    %132 = arith.divf %130, %131 : vector<8x32xf32>
    %133 = arith.mulf %124, %101 : vector<8x32xf32>
    %134 = arith.mulf %118, %126 : vector<8x32xf32>
    %135 = arith.addf %133, %134 : vector<8x32xf32>
    %136 = math.tanh %135 : vector<8x32xf32>
    %137 = arith.mulf %132, %136 : vector<8x32xf32>
    %138 = arith.index_cast %c3_i32 : i32 to index
    %c0_36 = arith.constant 0 : index
    %c0_37 = arith.constant 0 : index
    %139 = vector.load %arg6[%138, %c0_36, %c0_37] : memref<8x8x32xf32, #tpu.memory_space<vmem>>, vector<1x8x32xf32>
    %140 = vector.shape_cast %139 : vector<1x8x32xf32> to vector<8x32xf32>
    %141 = vector.shape_cast %137 : vector<8x32xf32> to vector<1x8x32xf32>
    tpu.vector_store %arg6[%138, %c0_36, %c0_37], %141 {strides = array<i32>} : memref<8x8x32xf32, #tpu.memory_space<vmem>>, vector<1x8x32xf32>,
    %c4_i32 = arith.constant 4 : i32
    %142 = arith.index_cast %c4_i32 : i32 to index
    %c0_38 = arith.constant 0 : index
    %c0_39 = arith.constant 0 : index
    %143 = vector.load %arg2[%142, %c0_38, %c0_39] : memref<8x8x128xf32, #tpu.memory_space<vmem>>, vector<1x8x128xf32>
    %144 = vector.shape_cast %143 : vector<1x8x128xf32> to vector<8x128xf32>
    %cst_40 = arith.constant dense<0.000000e+00> : vector<8x128xf32>
    %145 = tpu.matmul %137, %3, %cst_40 {dimension_numbers = #tpu.dot_dimension_numbers<[1], [0], [0], [1], [0, 0, 1, 1], [], []>} : vector<8x32xf32>, vector<32x128xf32>, vector<8x128xf32> -> vector<8x128xf32>
    %146 = arith.addf %144, %145 : vector<8x128xf32>
    %147 = vector.extract_strided_slice %146 {offsets = [0, 0], sizes = [8, 32], strides = [1, 1]} : vector<8x128xf32> to vector<8x32xf32>
    %148 = arith.negf %147 : vector<8x32xf32>
    %149 = math.exp %148 : vector<8x32xf32>
    %cst_41 = arith.constant 1.000000e+00 : f32
    %150 = vector.broadcast %cst_41 : f32 to vector<8x32xf32>
    %151 = arith.addf %150, %149 : vector<8x32xf32>
    %152 = arith.divf %150, %151 : vector<8x32xf32>
    %153 = vector.extract_strided_slice %146 {offsets = [0, 32], sizes = [8, 32], strides = [1, 1]} : vector<8x128xf32> to vector<8x32xf32>
    %154 = arith.negf %153 : vector<8x32xf32>
    %155 = math.exp %154 : vector<8x32xf32>
    %cst_42 = arith.constant 1.000000e+00 : f32
    %156 = vector.broadcast %cst_42 : f32 to vector<8x32xf32>
    %157 = arith.addf %156, %155 : vector<8x32xf32>
    %158 = arith.divf %156, %157 : vector<8x32xf32>
    %159 = vector.extract_strided_slice %146 {offsets = [0, 64], sizes = [8, 32], strides = [1, 1]} : vector<8x128xf32> to vector<8x32xf32>
    %160 = math.tanh %159 : vector<8x32xf32>
    %161 = vector.extract_strided_slice %146 {offsets = [0, 96], sizes = [8, 32], strides = [1, 1]} : vector<8x128xf32> to vector<8x32xf32>
    %162 = arith.negf %161 : vector<8x32xf32>
    %163 = math.exp %162 : vector<8x32xf32>
    %cst_43 = arith.constant 1.000000e+00 : f32
    %164 = vector.broadcast %cst_43 : f32 to vector<8x32xf32>
    %165 = arith.addf %164, %163 : vector<8x32xf32>
    %166 = arith.divf %164, %165 : vector<8x32xf32>
    %167 = arith.mulf %158, %135 : vector<8x32xf32>
    %168 = arith.mulf %152, %160 : vector<8x32xf32>
    %169 = arith.addf %167, %168 : vector<8x32xf32>
    %170 = math.tanh %169 : vector<8x32xf32>
    %171 = arith.mulf %166, %170 : vector<8x32xf32>
    %172 = arith.index_cast %c4_i32 : i32 to index
    %c0_44 = arith.constant 0 : index
    %c0_45 = arith.constant 0 : index
    %173 = vector.load %arg6[%172, %c0_44, %c0_45] : memref<8x8x32xf32, #tpu.memory_space<vmem>>, vector<1x8x32xf32>
    %174 = vector.shape_cast %173 : vector<1x8x32xf32> to vector<8x32xf32>
    %175 = vector.shape_cast %171 : vector<8x32xf32> to vector<1x8x32xf32>
    tpu.vector_store %arg6[%172, %c0_44, %c0_45], %175 {strides = array<i32>} : memref<8x8x32xf32, #tpu.memory_space<vmem>>, vector<1x8x32xf32>,
    %c5_i32 = arith.constant 5 : i32
    %176 = arith.index_cast %c5_i32 : i32 to index
    %c0_46 = arith.constant 0 : index
    %c0_47 = arith.constant 0 : index
    %177 = vector.load %arg2[%176, %c0_46, %c0_47] : memref<8x8x128xf32, #tpu.memory_space<vmem>>, vector<1x8x128xf32>
    %178 = vector.shape_cast %177 : vector<1x8x128xf32> to vector<8x128xf32>
    %cst_48 = arith.constant dense<0.000000e+00> : vector<8x128xf32>
    %179 = tpu.matmul %171, %3, %cst_48 {dimension_numbers = #tpu.dot_dimension_numbers<[1], [0], [0], [1], [0, 0, 1, 1], [], []>} : vector<8x32xf32>, vector<32x128xf32>, vector<8x128xf32> -> vector<8x128xf32>
    %180 = arith.addf %178, %179 : vector<8x128xf32>
    %181 = vector.extract_strided_slice %180 {offsets = [0, 0], sizes = [8, 32], strides = [1, 1]} : vector<8x128xf32> to vector<8x32xf32>
    %182 = arith.negf %181 : vector<8x32xf32>
    %183 = math.exp %182 : vector<8x32xf32>
    %cst_49 = arith.constant 1.000000e+00 : f32
    %184 = vector.broadcast %cst_49 : f32 to vector<8x32xf32>
    %185 = arith.addf %184, %183 : vector<8x32xf32>
    %186 = arith.divf %184, %185 : vector<8x32xf32>
    %187 = vector.extract_strided_slice %180 {offsets = [0, 32], sizes = [8, 32], strides = [1, 1]} : vector<8x128xf32> to vector<8x32xf32>
    %188 = arith.negf %187 : vector<8x32xf32>
    %189 = math.exp %188 : vector<8x32xf32>
    %cst_50 = arith.constant 1.000000e+00 : f32
    %190 = vector.broadcast %cst_50 : f32 to vector<8x32xf32>
    %191 = arith.addf %190, %189 : vector<8x32xf32>
    %192 = arith.divf %190, %191 : vector<8x32xf32>
    %193 = vector.extract_strided_slice %180 {offsets = [0, 64], sizes = [8, 32], strides = [1, 1]} : vector<8x128xf32> to vector<8x32xf32>
    %194 = math.tanh %193 : vector<8x32xf32>
    %195 = vector.extract_strided_slice %180 {offsets = [0, 96], sizes = [8, 32], strides = [1, 1]} : vector<8x128xf32> to vector<8x32xf32>
    %196 = arith.negf %195 : vector<8x32xf32>
    %197 = math.exp %196 : vector<8x32xf32>
    %cst_51 = arith.constant 1.000000e+00 : f32
    %198 = vector.broadcast %cst_51 : f32 to vector<8x32xf32>
    %199 = arith.addf %198, %197 : vector<8x32xf32>
    %200 = arith.divf %198, %199 : vector<8x32xf32>
    %201 = arith.mulf %192, %169 : vector<8x32xf32>
    %202 = arith.mulf %186, %194 : vector<8x32xf32>
    %203 = arith.addf %201, %202 : vector<8x32xf32>
    %204 = math.tanh %203 : vector<8x32xf32>
    %205 = arith.mulf %200, %204 : vector<8x32xf32>
    %206 = arith.index_cast %c5_i32 : i32 to index
    %c0_52 = arith.constant 0 : index
    %c0_53 = arith.constant 0 : index
    %207 = vector.load %arg6[%206, %c0_52, %c0_53] : memref<8x8x32xf32, #tpu.memory_space<vmem>>, vector<1x8x32xf32>
    %208 = vector.shape_cast %207 : vector<1x8x32xf32> to vector<8x32xf32>
    %209 = vector.shape_cast %205 : vector<8x32xf32> to vector<1x8x32xf32>
    tpu.vector_store %arg6[%206, %c0_52, %c0_53], %209 {strides = array<i32>} : memref<8x8x32xf32, #tpu.memory_space<vmem>>, vector<1x8x32xf32>,
    %c6_i32 = arith.constant 6 : i32
    %210 = arith.index_cast %c6_i32 : i32 to index
    %c0_54 = arith.constant 0 : index
    %c0_55 = arith.constant 0 : index
    %211 = vector.load %arg2[%210, %c0_54, %c0_55] : memref<8x8x128xf32, #tpu.memory_space<vmem>>, vector<1x8x128xf32>
    %212 = vector.shape_cast %211 : vector<1x8x128xf32> to vector<8x128xf32>
    %cst_56 = arith.constant dense<0.000000e+00> : vector<8x128xf32>
    %213 = tpu.matmul %205, %3, %cst_56 {dimension_numbers = #tpu.dot_dimension_numbers<[1], [0], [0], [1], [0, 0, 1, 1], [], []>} : vector<8x32xf32>, vector<32x128xf32>, vector<8x128xf32> -> vector<8x128xf32>
    %214 = arith.addf %212, %213 : vector<8x128xf32>
    %215 = vector.extract_strided_slice %214 {offsets = [0, 0], sizes = [8, 32], strides = [1, 1]} : vector<8x128xf32> to vector<8x32xf32>
    %216 = arith.negf %215 : vector<8x32xf32>
    %217 = math.exp %216 : vector<8x32xf32>
    %cst_57 = arith.constant 1.000000e+00 : f32
    %218 = vector.broadcast %cst_57 : f32 to vector<8x32xf32>
    %219 = arith.addf %218, %217 : vector<8x32xf32>
    %220 = arith.divf %218, %219 : vector<8x32xf32>
    %221 = vector.extract_strided_slice %214 {offsets = [0, 32], sizes = [8, 32], strides = [1, 1]} : vector<8x128xf32> to vector<8x32xf32>
    %222 = arith.negf %221 : vector<8x32xf32>
    %223 = math.exp %222 : vector<8x32xf32>
    %cst_58 = arith.constant 1.000000e+00 : f32
    %224 = vector.broadcast %cst_58 : f32 to vector<8x32xf32>
    %225 = arith.addf %224, %223 : vector<8x32xf32>
    %226 = arith.divf %224, %225 : vector<8x32xf32>
    %227 = vector.extract_strided_slice %214 {offsets = [0, 64], sizes = [8, 32], strides = [1, 1]} : vector<8x128xf32> to vector<8x32xf32>
    %228 = math.tanh %227 : vector<8x32xf32>
    %229 = vector.extract_strided_slice %214 {offsets = [0, 96], sizes = [8, 32], strides = [1, 1]} : vector<8x128xf32> to vector<8x32xf32>
    %230 = arith.negf %229 : vector<8x32xf32>
    %231 = math.exp %230 : vector<8x32xf32>
    %cst_59 = arith.constant 1.000000e+00 : f32
    %232 = vector.broadcast %cst_59 : f32 to vector<8x32xf32>
    %233 = arith.addf %232, %231 : vector<8x32xf32>
    %234 = arith.divf %232, %233 : vector<8x32xf32>
    %235 = arith.mulf %226, %203 : vector<8x32xf32>
    %236 = arith.mulf %220, %228 : vector<8x32xf32>
    %237 = arith.addf %235, %236 : vector<8x32xf32>
    %238 = math.tanh %237 : vector<8x32xf32>
    %239 = arith.mulf %234, %238 : vector<8x32xf32>
    %240 = arith.index_cast %c6_i32 : i32 to index
    %c0_60 = arith.constant 0 : index
    %c0_61 = arith.constant 0 : index
    %241 = vector.load %arg6[%240, %c0_60, %c0_61] : memref<8x8x32xf32, #tpu.memory_space<vmem>>, vector<1x8x32xf32>
    %242 = vector.shape_cast %241 : vector<1x8x32xf32> to vector<8x32xf32>
    %243 = vector.shape_cast %239 : vector<8x32xf32> to vector<1x8x32xf32>
    tpu.vector_store %arg6[%240, %c0_60, %c0_61], %243 {strides = array<i32>} : memref<8x8x32xf32, #tpu.memory_space<vmem>>, vector<1x8x32xf32>,
    %c7_i32 = arith.constant 7 : i32
    %244 = arith.index_cast %c7_i32 : i32 to index
    %c0_62 = arith.constant 0 : index
    %c0_63 = arith.constant 0 : index
    %245 = vector.load %arg2[%244, %c0_62, %c0_63] : memref<8x8x128xf32, #tpu.memory_space<vmem>>, vector<1x8x128xf32>
    %246 = vector.shape_cast %245 : vector<1x8x128xf32> to vector<8x128xf32>
    %cst_64 = arith.constant dense<0.000000e+00> : vector<8x128xf32>
    %247 = tpu.matmul %239, %3, %cst_64 {dimension_numbers = #tpu.dot_dimension_numbers<[1], [0], [0], [1], [0, 0, 1, 1], [], []>} : vector<8x32xf32>, vector<32x128xf32>, vector<8x128xf32> -> vector<8x128xf32>
    %248 = arith.addf %246, %247 : vector<8x128xf32>
    %249 = vector.extract_strided_slice %248 {offsets = [0, 0], sizes = [8, 32], strides = [1, 1]} : vector<8x128xf32> to vector<8x32xf32>
    %250 = arith.negf %249 : vector<8x32xf32>
    %251 = math.exp %250 : vector<8x32xf32>
    %cst_65 = arith.constant 1.000000e+00 : f32
    %252 = vector.broadcast %cst_65 : f32 to vector<8x32xf32>
    %253 = arith.addf %252, %251 : vector<8x32xf32>
    %254 = arith.divf %252, %253 : vector<8x32xf32>
    %255 = vector.extract_strided_slice %248 {offsets = [0, 32], sizes = [8, 32], strides = [1, 1]} : vector<8x128xf32> to vector<8x32xf32>
    %256 = arith.negf %255 : vector<8x32xf32>
    %257 = math.exp %256 : vector<8x32xf32>
    %cst_66 = arith.constant 1.000000e+00 : f32
    %258 = vector.broadcast %cst_66 : f32 to vector<8x32xf32>
    %259 = arith.addf %258, %257 : vector<8x32xf32>
    %260 = arith.divf %258, %259 : vector<8x32xf32>
    %261 = vector.extract_strided_slice %248 {offsets = [0, 64], sizes = [8, 32], strides = [1, 1]} : vector<8x128xf32> to vector<8x32xf32>
    %262 = math.tanh %261 : vector<8x32xf32>
    %263 = vector.extract_strided_slice %248 {offsets = [0, 96], sizes = [8, 32], strides = [1, 1]} : vector<8x128xf32> to vector<8x32xf32>
    %264 = arith.negf %263 : vector<8x32xf32>
    %265 = math.exp %264 : vector<8x32xf32>
    %cst_67 = arith.constant 1.000000e+00 : f32
    %266 = vector.broadcast %cst_67 : f32 to vector<8x32xf32>
    %267 = arith.addf %266, %265 : vector<8x32xf32>
    %268 = arith.divf %266, %267 : vector<8x32xf32>
    %269 = arith.mulf %260, %237 : vector<8x32xf32>
    %270 = arith.mulf %254, %262 : vector<8x32xf32>
    %271 = arith.addf %269, %270 : vector<8x32xf32>
    %272 = math.tanh %271 : vector<8x32xf32>
    %273 = arith.mulf %268, %272 : vector<8x32xf32>
    %274 = arith.index_cast %c7_i32 : i32 to index
    %c0_68 = arith.constant 0 : index
    %c0_69 = arith.constant 0 : index
    %275 = vector.load %arg6[%274, %c0_68, %c0_69] : memref<8x8x32xf32, #tpu.memory_space<vmem>>, vector<1x8x32xf32>
    %276 = vector.shape_cast %275 : vector<1x8x32xf32> to vector<8x32xf32>
    %277 = vector.shape_cast %273 : vector<8x32xf32> to vector<1x8x32xf32>
    tpu.vector_store %arg6[%274, %c0_68, %c0_69], %277 {strides = array<i32>} : memref<8x8x32xf32, #tpu.memory_space<vmem>>, vector<1x8x32xf32>,
    %c8_i32 = arith.constant 8 : i32
    %c0_70 = arith.constant 0 : index
    %c0_71 = arith.constant 0 : index
    %278 = vector.load %arg7[%c0_70, %c0_71] : memref<8x32xf32, #tpu.memory_space<vmem>>, vector<8x32xf32>
    tpu.vector_store %arg7[%c0_70, %c0_71], %273 {strides = array<i32>} : memref<8x32xf32, #tpu.memory_space<vmem>>, vector<8x32xf32>,
    %c0_72 = arith.constant 0 : index
    %c0_73 = arith.constant 0 : index
    %279 = vector.load %arg8[%c0_72, %c0_73] : memref<8x32xf32, #tpu.memory_space<vmem>>, vector<8x32xf32>
    tpu.vector_store %arg8[%c0_72, %c0_73], %271 {strides = array<i32>} : memref<8x32xf32, #tpu.memory_space<vmem>>, vector<8x32xf32>,
    return
  }
  func.func @transform_0(%arg0: i32, %arg1: i32) -> (i32, i32, i32) {
    %c0_i32 = arith.constant 0 : i32
    %c0_i32_0 = arith.constant 0 : i32
    return %arg1, %arg0, %c0_i32 : i32, i32, i32
  }
  func.func @transform_1(%arg0: i32, %arg1: i32) -> (i32, i32) {
    %c0_i32 = arith.constant 0 : i32
    %c0_i32_0 = arith.constant 0 : i32
    %c0_i32_1 = arith.constant 0 : i32
    return %c0_i32, %c0_i32_0 : i32, i32
  }
  func.func @transform_2(%arg0: i32, %arg1: i32) -> (i32, i32) {
    %c0_i32 = arith.constant 0 : i32
    %c0_i32_0 = arith.constant 0 : i32
    return %arg0, %c0_i32 : i32, i32
  }
  func.func @transform_3(%arg0: i32, %arg1: i32) -> (i32, i32) {
    %c0_i32 = arith.constant 0 : i32
    %c0_i32_0 = arith.constant 0 : i32
    return %arg0, %c0_i32 : i32, i32
  }
  func.func @transform_4(%arg0: i32, %arg1: i32) -> (i32, i32, i32) {
    %c0_i32 = arith.constant 0 : i32
    %c0_i32_0 = arith.constant 0 : i32
    return %arg1, %arg0, %c0_i32 : i32, i32, i32
  }
  func.func @transform_5(%arg0: i32, %arg1: i32) -> (i32, i32) {
    %c0_i32 = arith.constant 0 : i32
    %c0_i32_0 = arith.constant 0 : i32
    return %arg0, %c0_i32 : i32, i32
  }
  func.func @transform_6(%arg0: i32, %arg1: i32) -> (i32, i32) {
    %c0_i32 = arith.constant 0 : i32
    %c0_i32_0 = arith.constant 0 : i32
    return %arg0, %c0_i32 : i32, i32
  }
}

</mosaic_0001>

<bundles_post_ra>
// kernel: my_lstm_forward.1
= control target key start
LH: loop header
LB: loop body
LE: loop exit
PB: predicated region body
PF: predicated region fallthrough
CT: control target
= control target key end

     0   :  { %12 = vsyncpa [#allocation3], 0  ;;  %v1245_v3 = vmov 0.0|0.0   ;;  %vm1246_vm0 = vmmov 0   ;;  %v1247_v6 = vmov 0.0   ;;  %vm27_vm1 = vcmask 261120   ;;  %s1483_s0 = inlined_call_operand.vmem [shape: f32[8,8,128], index: 0, kind: input, shape index: {}]   ;;  %s1484_s1 = inlined_call_operand.vmem [shape: f32[32,128], index: 1, kind: input, shape index: {}]   ;;  %s1485_s2 = inlined_call_operand.vmem [shape: f32[8,32], index: 2, kind: input, shape index: {}, may-alias: {2,3}]   ;;  %s1486_s3 = inlined_call_operand.vmem [shape: f32[8,32], index: 3, kind: input, shape index: {}, may-alias: {2,3}]   ;;  %s1487_s4 = inlined_call_operand.vmem [shape: f32[8,8,32], index: 4, kind: output, shape index: {0}]   ;;  %s1488_s5 = inlined_call_operand.hbm [shape: f32[8,32], index: 5, kind: output, shape index: {1}]   ;;  %s1489_s6 = inlined_call_operand.hbm [shape: f32[8,32], index: 6, kind: output, shape index: {2}]  }
   0x1   :  { %v31_v0 = vld [vmem:[%s1484_s1] sm:$0xff]  ;;  %v32_v1 = vld [vmem:[%s1484_s1 + $0x8] sm:$0xff]  ;;  %v33_v2 = vld [vmem:[%s1484_s1 + $0x10] sm:$0xff]  ;;  %1077 = vmatprep.subr.bf16.mxu0 %v1245_v3  ;;  %997 = vmatprep.mubr.msk.f32.mxu0 %vm1246_vm0, %v1247_v6 }
   0x2   :  { %v1298_v4 = vpack.c.bf16 %v32_v1, %v31_v0  ;;  %v34_v5 = vld [vmem:[%s1484_s1 + $0x18] sm:$0xff]  ;;  %v26_v7 = vld [vmem:[%s1485_s2] sm:$0xff]  ;;  %1083 = vmatprep.subr.bf16.mxu1 %v1245_v3  ;;  %1008 = vmatprep.mubr.msk.f32.mxu1 %vm1246_vm0, %v1247_v6 }
   0x3   :  { %28 = vst.msk [vmem:[#allocation2] sm:$0xff] %vm27_vm1, %v26_v7 }
   0x4   :  { %13 = vsyncpa [#allocation5], 0  ;;  %1079 = vmatpush3.bf16.msra.mxu0 %v1298_v4  ;;  %v1313_v8 = vpack.c.bf16 %v34_v5, %v33_v2  ;;  %1085 = vmatpush3.bf16.msra.mxu1 %v1298_v4  ;;  %v29_v10 = vld [vmem:[%s1486_s3] sm:$0xff]  ;;  %s1248_s9 = smov 64   ;;  %s1249_s10 = smov 32   ;;  %v921_v31 = vld [vmem:[%s1483_s0 + $0x8] sm:$0xff] }
   0x5   :  { %1080 = vmatprep.subr.bf16.mxu0 %v1245_v3  ;;  %1086 = vmatprep.subr.bf16.mxu1 %v1245_v3  ;;  %30 = vst.msk [vmem:[#allocation4] sm:$0xff] %vm27_vm1, %v29_v10  ;;  %v37_v11 = vld [vmem:[%s1483_s0] sm:$0xff]  ;;  %v925_v49 = vld [vmem:[%s1483_s0 + $0x10] sm:$0xff]  ;;  %v929_v5 = vld [vmem:[%s1483_s0 + $0x18] sm:$0xff]  ;;  %s1251_s13 = smov [#allocation4]  }
   0x6   :  { %s905_s14 = sshll.u32 %s1251_s13, 4  ;;  %s906_s14 = int_to_ptr.vmem [resolvable:$true] %s905_s14 }
   0x7   :  { %s1197_s15 = scalar_lea.vmem %s906_s14, 128  ;;  %p1202_p1 = scmp.lt.s32.totalorder %s906_s14, %s906_s14 }
   0x8   :  { %1082 = vmatpush3.bf16.msra.mxu0 %v1313_v8  ;;  %1088 = vmatpush3.bf16.msra.mxu1 %v1313_v8  ;;  %p1198_p0 = scmp.ne.s32.totalorder %s906_s14, %s1197_s15  ;;  %p1203_p2 = scmp.lt.s32.totalorder %s1197_s15, %s1197_s15 }
   0x9   :  { %1089 = vmatprep.subr.bf16.mxu0 %v1245_v3  ;;  %1095 = vmatprep.subr.bf16.mxu1 %v1245_v3 }
   0xa   :  { %v35_v9 = vld [vmem:[#allocation2] sm:$0xff]  ;;  %p1204_p3 = por %p1203_p2, %p1202_p1 }
   0xb   :  { %998 = vmatmul.mubr.msk.f32.vlgmr.msra.gmra.mrb[0].mxu0 %vm27_vm1, %v35_v9 }
   0xc   :  { %1091 = vmatpush3.bf16.msra.mxu0 %v1298_v4  ;;  %1019 = vmatprep.mubr.msk.f32.mxu0 %vm1246_vm0, %v1247_v6  ;;  %v36_v16 = vld [vmem:[#allocation4] sm:$0xff]  ;;  %p1205_p4 = pnand %p1204_p3, %p1198_p0 }
   0xd   :  { %1092 = vmatprep.subr.bf16.mxu0 %v1245_v3 }
  0x10   :  { %1094 = vmatpush3.bf16.msra.mxu0 %v1313_v8 }
  0x11   :  { %1101 = vmatprep.subr.bf16.mxu0 %v1245_v3 }
  0xde   :  { %v108_v12 = vpop.f32.mrb[0].mxu0 }
  0xdf   :  { %v112_v13 = vadd.f32 %v108_v12, %v37_v11  ;;  %v999_v14 = vpop.f32.mrb[1].mxu0 }
  0xe1   :  { %1133 = vtanh.f32 %v112_v13  ;;  %v920_v17 = vmul.f32 -1.442695, %v112_v13 }
  0xe3   :  { %1135 = vpow2.f32 %v920_v17 }
  0xeb   :  { %v1134_v15 = vpop.eup %1133 }
  0xec   :  { %126 = vrot.lane.b32.xlu0 %v1134_v15, %s1248_s9 }
  0xed   :  { %v1136_v18 = vpop.eup %1135 }
  0xee   :  { %v116_v19 = vadd.f32 1.0, %v1136_v18 }
  0xf0   :  { %121 = vrot.lane.b32.xlu0 %v36_v16, %s1249_s10  ;;  %1137 = vrcp.f32 %v116_v19 }
  0xfa   :  { %v1138_v20 = vpop.eup %1137 }
 0x15e   :  { %v127_v21 = vpop.permute.xlu0 %126 }
 0x15f   :  { %v129_v22 = vmul.f32 %v1138_v20, %v127_v21 }
 0x161   :  { %131 = vrot.lane.b32.xlu1 %v129_v22, %s1249_s10 }
 0x162   :  { %v122_v23 = vpop.permute.xlu0 %121 }
 0x163   :  { %v124_v24 = vmul.f32 %v1138_v20, %v122_v23 }
 0x1d3   :  { %v132_v25 = vpop.permute.xlu1 %131 }
 0x1d4   :  { %v134_v26 = vadd.f32 %v132_v25, %v124_v24  ;;  %v933_v25 = vld [vmem:[%s1483_s0 + $0x20] sm:$0xff] }
 0x1d6   :  { %1139 = vtanh.f32 %v134_v26 }
 0x1e0   :  { %v1140_v27 = vpop.eup %1139 }
 0x1e1   :  { %137 = vrot.lane.b32.xlu1 %v1140_v27, %s1248_s9 }
 0x253   :  { %v138_v28 = vpop.permute.xlu1 %137 }
 0x254   :  { %v140_v29 = vmul.f32 %v1138_v20, %v138_v28 }
 0x256   :  { %142 = vrot.lane.b32.xlu0 %v140_v29, %s1249_s10 }
 0x2c8   :  { %v143_v30 = vpop.permute.xlu0 %142 }
 0x2c9   :  { %145 = vst.msk [vmem:[%s1487_s4] sm:$0xff] %vm27_vm1, %v143_v30  ;;  %1009 = vmatmul.mubr.msk.f32.vlgmr.msra.gmra.mrb[0].mxu1 %vm27_vm1, %v143_v30 }
 0x2ca   :  { %1097 = vmatpush3.bf16.msra.mxu1 %v1298_v4  ;;  %1030 = vmatprep.mubr.msk.f32.mxu1 %vm1246_vm0, %v1247_v6 }
 0x2cb   :  { %1098 = vmatprep.subr.bf16.mxu1 %v1245_v3 }
 0x2ce   :  { %1100 = vmatpush3.bf16.msra.mxu1 %v1313_v8 }
 0x2cf   :  { %1107 = vmatprep.subr.bf16.mxu1 %v1245_v3 }
 0x39c   :  { %v216_v32 = vpop.f32.mrb[0].mxu1 }
 0x39d   :  { %v220_v33 = vadd.f32 %v921_v31, %v216_v32  ;;  %v1010_v34 = vpop.f32.mrb[1].mxu1 }
 0x39f   :  { %1141 = vtanh.f32 %v220_v33  ;;  %v923_v36 = vmul.f32 -1.442695, %v220_v33 }
 0x3a1   :  { %1143 = vpow2.f32 %v923_v36 }
 0x3a9   :  { %v1142_v35 = vpop.eup %1141 }
 0x3aa   :  { %230 = vrot.lane.b32.xlu1 %v1142_v35, %s1248_s9 }
 0x3ab   :  { %v1144_v37 = vpop.eup %1143 }
 0x3ac   :  { %v224_v38 = vadd.f32 1.0, %v1144_v37 }
 0x3ae   :  { %1145 = vrcp.f32 %v224_v38 }
 0x3b8   :  { %v1146_v39 = vpop.eup %1145 }
 0x3b9   :  { %v228_v42 = vmul.f32 %v1146_v39, %v134_v26 }
 0x41c   :  { %v231_v40 = vpop.permute.xlu1 %230 }
 0x41d   :  { %v233_v41 = vmul.f32 %v1146_v39, %v231_v40 }
 0x41f   :  { %235 = vrot.lane.b32.xlu0 %v233_v41, %s1249_s10 }
 0x491   :  { %v236_v43 = vpop.permute.xlu0 %235 }
 0x492   :  { %v238_v44 = vadd.f32 %v236_v43, %v228_v42  ;;  %v937_v43 = vld [vmem:[%s1483_s0 + $0x28] sm:$0xff] }
 0x494   :  { %1147 = vtanh.f32 %v238_v44 }
 0x49e   :  { %v1148_v45 = vpop.eup %1147 }
 0x49f   :  { %241 = vrot.lane.b32.xlu1 %v1148_v45, %s1248_s9 }
 0x511   :  { %v242_v46 = vpop.permute.xlu1 %241 }
 0x512   :  { %v244_v47 = vmul.f32 %v1146_v39, %v242_v46 }
 0x514   :  { %246 = vrot.lane.b32.xlu0 %v244_v47, %s1249_s10 }
 0x586   :  { %v247_v48 = vpop.permute.xlu0 %246 }
 0x587   :  { %924 = vst.msk [vmem:[%s1487_s4 + $0x8] sm:$0xff] %vm27_vm1, %v247_v48  ;;  %1020 = vmatmul.mubr.msk.f32.vlgmr.msra.gmra.mrb[2].mxu0 %vm27_vm1, %v247_v48 }
 0x588   :  { %1103 = vmatpush3.bf16.msra.mxu0 %v1298_v4  ;;  %1041 = vmatprep.mubr.msk.f32.mxu0 %vm1246_vm0, %v1247_v6 }
 0x589   :  { %1104 = vmatprep.subr.bf16.mxu0 %v1245_v3 }
 0x58c   :  { %1106 = vmatpush3.bf16.msra.mxu0 %v1313_v8 }
 0x58d   :  { %1113 = vmatprep.subr.bf16.mxu0 %v1245_v3 }
 0x65a   :  { %v321_v50 = vpop.f32.mrb[2].mxu0 }
 0x65b   :  { %v325_v51 = vadd.f32 %v925_v49, %v321_v50  ;;  %v1021_v52 = vpop.f32.mrb[3].mxu0 }
 0x65d   :  { %1149 = vtanh.f32 %v325_v51  ;;  %v927_v54 = vmul.f32 -1.442695, %v325_v51 }
 0x65f   :  { %1151 = vpow2.f32 %v927_v54 }
 0x667   :  { %v1150_v53 = vpop.eup %1149 }
 0x668   :  { %335 = vrot.lane.b32.xlu1 %v1150_v53, %s1248_s9 }
 0x669   :  { %v1152_v55 = vpop.eup %1151 }
 0x66a   :  { %v329_v56 = vadd.f32 1.0, %v1152_v55 }
 0x66c   :  { %1153 = vrcp.f32 %v329_v56 }
 0x676   :  { %v1154_v57 = vpop.eup %1153 }
 0x677   :  { %v333_v60 = vmul.f32 %v1154_v57, %v238_v44 }
 0x6da   :  { %v336_v58 = vpop.permute.xlu1 %335 }
 0x6db   :  { %v338_v59 = vmul.f32 %v1154_v57, %v336_v58 }
 0x6dd   :  { %340 = vrot.lane.b32.xlu0 %v338_v59, %s1249_s10 }
 0x74f   :  { %v341_v61 = vpop.permute.xlu0 %340 }
 0x750   :  { %v343_v62 = vadd.f32 %v341_v61, %v333_v60 }
 0x752   :  { %1155 = vtanh.f32 %v343_v62 }
 0x75c   :  { %v1156_v63 = vpop.eup %1155 }
 0x75d   :  { %346 = vrot.lane.b32.xlu1 %v1156_v63, %s1248_s9 }
 0x7cf   :  { %v347_v0 = vpop.permute.xlu1 %346 }
 0x7d0   :  { %v349_v1 = vmul.f32 %v1154_v57, %v347_v0  ;;  %v941_v57 = vld [vmem:[%s1483_s0 + $0x30] sm:$0xff] }
 0x7d2   :  { %351 = vrot.lane.b32.xlu0 %v349_v1, %s1249_s10 }
 0x844   :  { %v352_v2 = vpop.permute.xlu0 %351 }
 0x845   :  { %928 = vst.msk [vmem:[%s1487_s4 + $0x10] sm:$0xff] %vm27_vm1, %v352_v2  ;;  %1031 = vmatmul.mubr.msk.f32.vlgmr.msra.gmra.mrb[2].mxu1 %vm27_vm1, %v352_v2 }
 0x846   :  { %1109 = vmatpush3.bf16.msra.mxu1 %v1298_v4  ;;  %1052 = vmatprep.mubr.msk.f32.mxu1 %vm1246_vm0, %v1247_v6 }
 0x847   :  { %1110 = vmatprep.subr.bf16.mxu1 %v1245_v3 }
 0x84a   :  { %1112 = vmatpush3.bf16.msra.mxu1 %v1313_v8 }
 0x84b   :  { %1119 = vmatprep.subr.bf16.mxu1 %v1245_v3 }
 0x918   :  { %v426_v7 = vpop.f32.mrb[2].mxu1 }
 0x919   :  { %v430_v9 = vadd.f32 %v929_v5, %v426_v7  ;;  %v1032_v10 = vpop.f32.mrb[3].mxu1 }
 0x91b   :  { %1157 = vtanh.f32 %v430_v9  ;;  %v931_v12 = vmul.f32 -1.442695, %v430_v9 }
 0x91d   :  { %1159 = vpow2.f32 %v931_v12 }
 0x925   :  { %v1158_v11 = vpop.eup %1157 }
 0x926   :  { %440 = vrot.lane.b32.xlu1 %v1158_v11, %s1248_s9 }
 0x927   :  { %v1160_v13 = vpop.eup %1159 }
 0x928   :  { %v434_v14 = vadd.f32 1.0, %v1160_v13 }
 0x92a   :  { %1161 = vrcp.f32 %v434_v14 }
 0x934   :  { %v1162_v15 = vpop.eup %1161 }
 0x935   :  { %v438_v18 = vmul.f32 %v1162_v15, %v343_v62 }
 0x998   :  { %v441_v16 = vpop.permute.xlu1 %440 }
 0x999   :  { %v443_v17 = vmul.f32 %v1162_v15, %v441_v16 }
 0x99b   :  { %445 = vrot.lane.b32.xlu0 %v443_v17, %s1249_s10 }
 0xa0d   :  { %v446_v19 = vpop.permute.xlu0 %445 }
 0xa0e   :  { %v448_v20 = vadd.f32 %v446_v19, %v438_v18 }
 0xa10   :  { %1163 = vtanh.f32 %v448_v20 }
 0xa1a   :  { %v1164_v21 = vpop.eup %1163 }
 0xa1b   :  { %451 = vrot.lane.b32.xlu1 %v1164_v21, %s1248_s9 }
 0xa8d   :  { %v452_v22 = vpop.permute.xlu1 %451 }
 0xa8e   :  { %v454_v23 = vmul.f32 %v1162_v15, %v452_v22  ;;  %v945_v15 = vld [vmem:[%s1483_s0 + $0x38] sm:$0xff]  ;;  %s1250_s0 = smov 96  }
 0xa90   :  { %456 = vrot.lane.b32.xlu0 %v454_v23, %s1249_s10 }
 0xb02   :  { %v457_v24 = vpop.permute.xlu0 %456 }
 0xb03   :  { %932 = vst.msk [vmem:[%s1487_s4 + $0x18] sm:$0xff] %vm27_vm1, %v457_v24  ;;  %1042 = vmatmul.mubr.msk.f32.vlgmr.msra.gmra.mrb[4].mxu0 %vm27_vm1, %v457_v24 }
 0xb04   :  { %1115 = vmatpush3.bf16.msra.mxu0 %v1298_v4  ;;  %1063 = vmatprep.mubr.msk.f32.mxu0 %vm1246_vm0, %v1247_v6 }
 0xb05   :  { %1116 = vmatprep.subr.bf16.mxu0 %v1245_v3 }
 0xb08   :  { %1118 = vmatpush3.bf16.msra.mxu0 %v1313_v8 }
 0xbd6   :  { %v531_v26 = vpop.f32.mrb[4].mxu0 }
 0xbd7   :  { %v535_v27 = vadd.f32 %v933_v25, %v531_v26  ;;  %v1043_v28 = vpop.f32.mrb[5].mxu0 }
 0xbd9   :  { %1165 = vtanh.f32 %v535_v27  ;;  %v935_v30 = vmul.f32 -1.442695, %v535_v27 }
 0xbdb   :  { %1167 = vpow2.f32 %v935_v30 }
 0xbe3   :  { %v1166_v29 = vpop.eup %1165 }
 0xbe4   :  { %545 = vrot.lane.b32.xlu1 %v1166_v29, %s1248_s9 }
 0xbe5   :  { %v1168_v31 = vpop.eup %1167 }
 0xbe6   :  { %v539_v32 = vadd.f32 1.0, %v1168_v31 }
 0xbe8   :  { %1169 = vrcp.f32 %v539_v32 }
 0xbf2   :  { %v1170_v33 = vpop.eup %1169 }
 0xbf3   :  { %v543_v36 = vmul.f32 %v1170_v33, %v448_v20 }
 0xc56   :  { %v546_v34 = vpop.permute.xlu1 %545 }
 0xc57   :  { %v548_v35 = vmul.f32 %v1170_v33, %v546_v34 }
 0xc59   :  { %550 = vrot.lane.b32.xlu0 %v548_v35, %s1249_s10 }
 0xccb   :  { %v551_v37 = vpop.permute.xlu0 %550 }
 0xccc   :  { %v553_v38 = vadd.f32 %v551_v37, %v543_v36 }
 0xcce   :  { %1171 = vtanh.f32 %v553_v38 }
 0xcd8   :  { %v1172_v39 = vpop.eup %1171 }
 0xcd9   :  { %556 = vrot.lane.b32.xlu1 %v1172_v39, %s1248_s9 }
 0xd4b   :  { %v557_v40 = vpop.permute.xlu1 %556 }
 0xd4c   :  { %v559_v41 = vmul.f32 %v1170_v33, %v557_v40 }
 0xd4e   :  { %561 = vrot.lane.b32.xlu0 %v559_v41, %s1249_s10 }
 0xdc0   :  { %v562_v42 = vpop.permute.xlu0 %561 }
 0xdc1   :  { %936 = vst.msk [vmem:[%s1487_s4 + $0x20] sm:$0xff] %vm27_vm1, %v562_v42  ;;  %1053 = vmatmul.mubr.msk.f32.vlgmr.msra.gmra.mrb[4].mxu1 %vm27_vm1, %v562_v42 }
 0xdc2   :  { %1121 = vmatpush3.bf16.msra.mxu1 %v1298_v4  ;;  %1074 = vmatprep.mubr.msk.f32.mxu1 %vm1246_vm0, %v1247_v6 }
 0xdc3   :  { %1122 = vmatprep.subr.bf16.mxu1 %v1245_v3 }
 0xdc6   :  { %1124 = vmatpush3.bf16.msra.mxu1 %v1313_v8 }
 0xe94   :  { %v636_v44 = vpop.f32.mrb[4].mxu1 }
 0xe95   :  { %v640_v45 = vadd.f32 %v937_v43, %v636_v44  ;;  %v1054_v46 = vpop.f32.mrb[5].mxu1 }
 0xe97   :  { %1173 = vtanh.f32 %v640_v45  ;;  %v939_v48 = vmul.f32 -1.442695, %v640_v45 }
 0xe99   :  { %1175 = vpow2.f32 %v939_v48 }
 0xea1   :  { %v1174_v47 = vpop.eup %1173 }
 0xea2   :  { %650 = vrot.lane.b32.xlu1 %v1174_v47, %s1248_s9 }
 0xea3   :  { %v1176_v4 = vpop.eup %1175 }
 0xea4   :  { %v644_v49 = vadd.f32 1.0, %v1176_v4 }
 0xea6   :  { %1177 = vrcp.f32 %v644_v49 }
 0xeb0   :  { %v1178_v6 = vpop.eup %1177 }
 0xeb1   :  { %v648_v8 = vmul.f32 %v1178_v6, %v553_v38 }
 0xf14   :  { %v651_v3 = vpop.permute.xlu1 %650 }
 0xf15   :  { %v653_v50 = vmul.f32 %v1178_v6, %v651_v3 }
 0xf17   :  { %655 = vrot.lane.b32.xlu0 %v653_v50, %s1249_s10 }
 0xf89   :  { %v656_v51 = vpop.permute.xlu0 %655 }
 0xf8a   :  { %v658_v52 = vadd.f32 %v656_v51, %v648_v8 }
 0xf8c   :  { %1179 = vtanh.f32 %v658_v52 }
 0xf96   :  { %v1180_v53 = vpop.eup %1179 }
 0xf97   :  { %661 = vrot.lane.b32.xlu1 %v1180_v53, %s1248_s9 }
0x1009   :  { %v662_v54 = vpop.permute.xlu1 %661 }
0x100a   :  { %v664_v55 = vmul.f32 %v1178_v6, %v662_v54 }
0x100c   :  { %666 = vrot.lane.b32.xlu0 %v664_v55, %s1249_s10 }
0x107e   :  { %v667_v56 = vpop.permute.xlu0 %666 }
0x107f   :  { %940 = vst.msk [vmem:[%s1487_s4 + $0x28] sm:$0xff] %vm27_vm1, %v667_v56  ;;  %1064 = vmatmul.mubr.msk.f32.vlgmr.msra.gmra.mrb[6].mxu0 %vm27_vm1, %v667_v56 }
0x1152   :  { %v741_v58 = vpop.f32.mrb[6].mxu0 }
0x1153   :  { %v745_v59 = vadd.f32 %v941_v57, %v741_v58  ;;  %v1065_v60 = vpop.f32.mrb[7].mxu0 }
0x1155   :  { %1181 = vtanh.f32 %v745_v59  ;;  %v943_v62 = vmul.f32 -1.442695, %v745_v59 }
0x1157   :  { %1183 = vpow2.f32 %v943_v62 }
0x115f   :  { %v1182_v61 = vpop.eup %1181 }
0x1160   :  { %755 = vrot.lane.b32.xlu1 %v1182_v61, %s1248_s9 }
0x1161   :  { %v1184_v63 = vpop.eup %1183 }
0x1162   :  { %v749_v0 = vadd.f32 1.0, %v1184_v63 }
0x1164   :  { %1185 = vrcp.f32 %v749_v0 }
0x116e   :  { %v1186_v1 = vpop.eup %1185 }
0x116f   :  { %v753_v7 = vmul.f32 %v1186_v1, %v658_v52 }
0x11d2   :  { %v756_v2 = vpop.permute.xlu1 %755 }
0x11d3   :  { %v758_v5 = vmul.f32 %v1186_v1, %v756_v2 }
0x11d5   :  { %760 = vrot.lane.b32.xlu0 %v758_v5, %s1249_s10 }
0x1247   :  { %v761_v9 = vpop.permute.xlu0 %760 }
0x1248   :  { %v763_v10 = vadd.f32 %v761_v9, %v753_v7 }
0x124a   :  { %1187 = vtanh.f32 %v763_v10 }
0x1254   :  { %v1188_v11 = vpop.eup %1187 }
0x1255   :  { %766 = vrot.lane.b32.xlu1 %v1188_v11, %s1248_s9 }
0x12c7   :  { %v767_v12 = vpop.permute.xlu1 %766 }
0x12c8   :  { %v769_v13 = vmul.f32 %v1186_v1, %v767_v12 }
0x12ca   :  { %771 = vrot.lane.b32.xlu0 %v769_v13, %s1249_s10 }
0x133c   :  { %v772_v14 = vpop.permute.xlu0 %771 }
0x133d   :  { %944 = vst.msk [vmem:[%s1487_s4 + $0x30] sm:$0xff] %vm27_vm1, %v772_v14  ;;  %1075 = vmatmul.mubr.msk.f32.vlgmr.msra.gmra.mrb[6].mxu1 %vm27_vm1, %v772_v14 }
0x1410   :  { %v846_v16 = vpop.f32.mrb[6].mxu1 }
0x1411   :  { %v850_v17 = vadd.f32 %v945_v15, %v846_v16  ;;  %v1076_v18 = vpop.f32.mrb[7].mxu1 }
0x1413   :  { %1189 = vtanh.f32 %v850_v17  ;;  %v947_v20 = vmul.f32 -1.442695, %v850_v17 }
0x1415   :  { %1191 = vpow2.f32 %v947_v20 }
0x141d   :  { %v1190_v19 = vpop.eup %1189 }
0x141e   :  { %860 = vrot.lane.b32.xlu1 %v1190_v19, %s1248_s9 }
0x141f   :  { %v1192_v21 = vpop.eup %1191 }
0x1420   :  { %v854_v22 = vadd.f32 1.0, %v1192_v21 }
0x1422   :  { %1193 = vrcp.f32 %v854_v22 }
0x142c   :  { %v1194_v23 = vpop.eup %1193 }
0x142d   :  { %v858_v26 = vmul.f32 %v1194_v23, %v763_v10 }
0x1490   :  { %v861_v24 = vpop.permute.xlu1 %860 }
0x1491   :  { %v863_v25 = vmul.f32 %v1194_v23, %v861_v24 }
0x1493   :  { %865 = vrot.lane.b32.xlu0 %v863_v25, %s1249_s10 }
0x1505   :  { %v866_v27 = vpop.permute.xlu0 %865 }
0x1506   :  { %v868_v28 = vadd.f32 %v866_v27, %v858_v26 }
0x1508   :  { %1195 = vtanh.f32 %v868_v28 }
0x1512   :  { %v1196_v29 = vpop.eup %1195 }
0x1513   :  { %871 = vrot.lane.b32.xlu1 %v1196_v29, %s1248_s9 }
0x1517   :  { %883 = vrot.lane.b32.xlu1 %v868_v28, %s1250_s0 }
0x1585   :  { %v872_v30 = vpop.permute.xlu1 %871 }
0x1586   :  { %v874_v31 = vmul.f32 %v1194_v23, %v872_v30 }
0x1588   :  { %876 = vrot.lane.b32.xlu0 %v874_v31, %s1249_s10 }
0x1589   :  { %v884_v32 = vpop.permute.xlu1 %883 }
0x158a   :  { %886 = vst.msk [vmem:[#allocation4] sm:$0xff] %vm27_vm1, %v884_v32 }
0x158b   :  { %1208 = shalt.err (!%p1205_p4)
}
0x158c   :  { %s1209_s17 = scalar_lea.hbm %s1489_s6, 128 }
0x158d   :  { %p1210_p5 = scmp.ne.s32.totalorder %s1489_s6, %s1209_s17  ;;  %p1213_p6 = scmp.lt.u32.totalorder %s1209_s17, %s1489_s6 }
0x158f   :  { %p1215_p7 = pnand %p1213_p6, %p1210_p5 }
0x1591   :  { %1218 = shalt.err (!%p1215_p7)
}
0x1592   :  { %908 = dma.vmem_to_hbm [thread:$0]  %s906_s14, 128, %s1489_s6, [#allocation5]  }
0x1593   :  { %s1252_s23 = smov [#allocation2]  }
0x1594   :  { %s895_s24 = sshll.u32 %s1252_s23, 4  ;;  %s896_s24 = int_to_ptr.vmem [resolvable:$true] %s895_s24 }
0x1595   :  { %s1219_s27 = scalar_lea.vmem %s896_s24, 128  ;;  %p1224_p9 = scmp.lt.s32.totalorder %s896_s24, %s896_s24 }
0x1596   :  { %p1220_p8 = scmp.ne.s32.totalorder %s896_s24, %s1219_s27  ;;  %p1225_p10 = scmp.lt.s32.totalorder %s1219_s27, %s1219_s27 }
0x1598   :  { %p1226_p11 = por %p1225_p10, %p1224_p9 }
0x159a   :  { %p1227_p12 = pnand %p1226_p11, %p1220_p8 }
0x15fa   :  { %v877_v33 = vpop.permute.xlu0 %876 }
0x15fb   :  { %948 = vst.msk [vmem:[%s1487_s4 + $0x38] sm:$0xff] %vm27_vm1, %v877_v33  ;;  %881 = vst.msk [vmem:[#allocation2] sm:$0xff] %vm27_vm1, %v877_v33 }
0x15fc   :  { %1230 = shalt.err (!%p1227_p12)
}
0x15fd   :  { %s1231_s29 = scalar_lea.hbm %s1488_s5, 128 }
0x15fe   :  { %p1232_p13 = scmp.ne.s32.totalorder %s1488_s5, %s1231_s29  ;;  %p1235_p0 = scmp.lt.u32.totalorder %s1231_s29, %s1488_s5 }
0x1600   :  { %p1237_p1 = pnand %p1235_p0, %p1232_p13 }
0x1602   :  { %1240 = shalt.err (!%p1237_p1)
}
0x1603   :  { %898 = dma.vmem_to_hbm [thread:$0]  %s896_s24, 128, %s1488_s5, [#allocation3]  }
0x1604   :  { %1241 = dma.done.wait [#allocation3], 128  }
0x1605   :  { %1242 = vsyncadd [#allocation3], 4294967168 }
0x1606   :  { %1243 = dma.done.wait [#allocation5], 128  }
0x1607   :  { %1244 = vsyncadd [#allocation5], 4294967168 }
0x1608   :  { %917 = vsyncpa [#allocation3], 1 }
0x1609   :  { %918 = vsyncpa [#allocation5], 1 }

</bundles_post_ra>
